<compile_context>
chip_gen: v7x
topology: tpu7x:2x2x1
jax: 0.10.0
libtpu: 0.0.40
codegen_flags: <defaults>
</compile_context>

<pallas_src>
import math

import jax
import jax.numpy as jnp
from jax.experimental import pallas as pl
from jax.experimental.pallas import tpu as pltpu


_OUT_LANES = 128          # lane-dense output slab width (column 0 is the result)
_MIB = 1024 * 1024


def _round_up(x, m):
    return (x + m - 1) // m * m


def _cdiv(a, b):
    return -(-a // b)


# ----------------------------------------------------------------------------
# Kernels
# ----------------------------------------------------------------------------

def detector_kernel(x1_ref, x2_ref, w1_ref, b1_ref, w2_ref, b2_ref,
                    w3a_ref, w3b_ref, b3_ref, o_ref):
    """Weights-stationary path: whole hidden dim resident, grid over batch."""
    # h = relu(x @ W + b): bf16 MXU operands, f32 accumulation, f32 bias/ReLU.
    h1 = jnp.dot(x1_ref[...], w1_ref[...], preferred_element_type=jnp.float32)
    h1 = jnp.maximum(h1 + b1_ref[...], 0.0)
    h2 = jnp.dot(x2_ref[...], w2_ref[...], preferred_element_type=jnp.float32)
    h2 = jnp.maximum(h2 + b2_ref[...], 0.0)

    # cat([h1, h2], 1) @ W3  ==  h1 @ W3[:H] + h2 @ W3[H:]   (no concatenate)
    out = jnp.dot(h1.astype(w3a_ref.dtype), w3a_ref[...],
                  preferred_element_type=jnp.float32)
    out = out + jnp.dot(h2.astype(w3b_ref.dtype), w3b_ref[...],
                        preferred_element_type=jnp.float32)

    # b3 is a scalar in SMEM; output tile is lane-dense (tile_b, 128) bf16.
    o_ref[...] = jnp.maximum(out + b3_ref[0, 0], 0.0).astype(o_ref.dtype)


def detector_kernel_ktiled(x1_ref, x2_ref, w1_ref, b1_ref, w2_ref, b2_ref,
                           w3a_ref, w3b_ref, b3_ref, o_ref,
                           h1_acc, h2_acc):
    """K-tiled path for large hidden: W1/W2 tiled along the reduction dim."""
    k = pl.program_id(1)

    @pl.when(k == 0)
    def _():
        h1_acc[...] = jnp.zeros_like(h1_acc)
        h2_acc[...] = jnp.zeros_like(h2_acc)

    h1_acc[...] += jnp.dot(x1_ref[...], w1_ref[...],
                           preferred_element_type=jnp.float32)
    h2_acc[...] += jnp.dot(x2_ref[...], w2_ref[...],
                           preferred_element_type=jnp.float32)

    @pl.when(k == pl.num_programs(1) - 1)
    def _():
        h1 = jnp.maximum(h1_acc[...] + b1_ref[...], 0.0)
        h2 = jnp.maximum(h2_acc[...] + b2_ref[...], 0.0)
        out = jnp.dot(h1.astype(w3a_ref.dtype), w3a_ref[...],
                      preferred_element_type=jnp.float32)
        out = out + jnp.dot(h2.astype(w3b_ref.dtype), w3b_ref[...],
                            preferred_element_type=jnp.float32)
        o_ref[...] = jnp.maximum(out + b3_ref[0, 0], 0.0).astype(o_ref.dtype)


# ----------------------------------------------------------------------------
# Tiling / VMEM heuristics
# ----------------------------------------------------------------------------

def _choose_tile_b(batch, hp):
    """Batch tile: bigger tiles for small Hp (mem-bound sweet spot), sized to
    minimize padded rows, and >= 2 grid steps so ("parallel",) can shard the
    batch across both v7x TensorCores."""
    tile_b_max = 512 if hp <= 512 else 256
    n_tiles = max(1, _cdiv(batch, tile_b_max))
    if n_tiles == 1 and batch >= 16:
        n_tiles = 2
    tile_b = _round_up(_cdiv(batch, n_tiles), 8)
    return tile_b, n_tiles


def _auto_k_tile(hp):
    """Enable K-tiling of W1/W2 only when the resident bf16 weight slabs would
    not comfortably fit in per-core VMEM (v7x: 64 MiB/TC). v5e/v6e (128 MiB
    physical) keep the weights-stationary design."""
    try:
        vmem_cap = pltpu.get_tpu_info().vmem_capacity_bytes
    except Exception:
        vmem_cap = 64 * _MIB                    # conservative: v7x per-core
    resident = 2 * hp * hp * 2 + 2 * hp * _OUT_LANES * 2
    if resident <= vmem_cap // 2:
        return None
    for cand in (512, 256, 128):
        if hp % cand == 0:
            return cand
    return None


def _vmem_limit_bytes(hp, tile_b, k_tile, out_bytes, single_buffer_weights):
    """Scoped-VMEM budget from the actual tile footprint, ~50% headroom."""
    wbuf = 1 if single_buffer_weights else 2
    if k_tile is None:
        need = (wbuf * 2 * hp * hp * 2            # W1, W2 resident (bf16)
                + wbuf * 2 * hp * _OUT_LANES * 2  # W3a, W3b (bf16)
                + wbuf * 2 * 8 * hp * 4           # b1, b2 (f32, 8-sublane pad)
                + 2 * 2 * tile_b * hp * 2         # x1, x2 double-buffered (bf16)
                + 2 * tile_b * _OUT_LANES * out_bytes)
    else:
        need = (2 * 2 * k_tile * hp * 2           # W1, W2 K-tiles, double-buffered
                + wbuf * 2 * hp * _OUT_LANES * 2  # W3a, W3b
                + wbuf * 2 * 8 * hp * 4           # b1, b2
                + 2 * 2 * tile_b * k_tile * 2     # x1, x2 K-tiles, double-buffered
                + 2 * tile_b * _OUT_LANES * out_bytes
                + 2 * tile_b * hp * 4)            # h1/h2 f32 accumulators
    return int(min(max(need * 3 // 2, 32 * _MIB), 100 * _MIB))


# ----------------------------------------------------------------------------
# Forward
# ----------------------------------------------------------------------------

def detector_forward(word1, word2, params, *, compute_dtype=jnp.bfloat16,
                     out_dtype=jnp.bfloat16, k_tile="auto"):
    w1, b1, w2, b2, w3, b3 = params
    B, H = word1.shape

    Hp = _round_up(H, 128)
    tile_b, n_b_tiles = _choose_tile_b(B, Hp)
    Bp = tile_b * n_b_tiles

    # bf16 activations in HBM (cast fuses with the zero pad); zero padding keeps
    # the math exact.
    x1 = jnp.pad(word1, ((0, Bp - B), (0, Hp - H))).astype(compute_dtype)
    x2 = jnp.pad(word2, ((0, Bp - B), (0, Hp - H))).astype(compute_dtype)
    w1p = jnp.pad(w1, ((0, Hp - H), (0, Hp - H))).astype(compute_dtype)
    w2p = jnp.pad(w2, ((0, Hp - H), (0, Hp - H))).astype(compute_dtype)
    b1p = jnp.pad(b1, ((0, 0), (0, Hp - H)))
    b2p = jnp.pad(b2, ((0, 0), (0, Hp - H)))
    # Split W3 (2H, 1) into halves; the single output column is padded to a full
    # 128-lane slab (extra columns are junk/relu(b3) and are sliced away below).
    w3a = jnp.pad(w3[:H], ((0, Hp - H), (0, _OUT_LANES - 1))).astype(compute_dtype)
    w3b = jnp.pad(w3[H:], ((0, Hp - H), (0, _OUT_LANES - 1))).astype(compute_dtype)
    b3s = b3.reshape(1, 1).astype(jnp.float32)      # true scalar -> SMEM

    if k_tile == "auto":
        k_tile = _auto_k_tile(Hp)
    if k_tile is not None:
        assert Hp % k_tile == 0, (Hp, k_tile)

    out_bytes = jnp.dtype(out_dtype).itemsize

    def run(single_buffer_weights):
        def inv_spec(shape):
            # Grid-invariant operands: fetch once, keep resident.
            kwargs = {}
            if single_buffer_weights:
                kwargs["pipeline_mode"] = pl.Buffered(1)
            if k_tile is None:
                return pl.BlockSpec(shape, lambda i: (0, 0), **kwargs)
            return pl.BlockSpec(shape, lambda i, k: (0, 0), **kwargs)

        b3_spec = pl.BlockSpec(memory_space=pltpu.MemorySpace.SMEM)
        vmem_limit = _vmem_limit_bytes(Hp, tile_b, k_tile, out_bytes,
                                       single_buffer_weights)

        if k_tile is None:
            grid = (n_b_tiles,)
            in_specs = [
                pl.BlockSpec((tile_b, Hp), lambda i: (i, 0)),
                pl.BlockSpec((tile_b, Hp), lambda i: (i, 0)),
                inv_spec((Hp, Hp)), inv_spec((1, Hp)),
                inv_spec((Hp, Hp)), inv_spec((1, Hp)),
                inv_spec((Hp, _OUT_LANES)), inv_spec((Hp, _OUT_LANES)),
                b3_spec,
            ]
            out_spec = pl.BlockSpec((tile_b, _OUT_LANES), lambda i: (i, 0))
            kernel = detector_kernel
            scratch = []
            dim_sem = ("parallel",)
        else:
            grid = (n_b_tiles, Hp // k_tile)
            in_specs = [
                pl.BlockSpec((tile_b, k_tile), lambda i, k: (i, k)),
                pl.BlockSpec((tile_b, k_tile), lambda i, k: (i, k)),
                pl.BlockSpec((k_tile, Hp), lambda i, k: (k, 0)),
                inv_spec((1, Hp)),
                pl.BlockSpec((k_tile, Hp), lambda i, k: (k, 0)),
                inv_spec((1, Hp)),
                inv_spec((Hp, _OUT_LANES)), inv_spec((Hp, _OUT_LANES)),
                b3_spec,
            ]
            out_spec = pl.BlockSpec((tile_b, _OUT_LANES), lambda i, k: (i, 0))
            kernel = detector_kernel_ktiled
            scratch = [pltpu.VMEM((tile_b, Hp), jnp.float32),
                       pltpu.VMEM((tile_b, Hp), jnp.float32)]
            dim_sem = ("parallel", "arbitrary")

        return pl.pallas_call(
            kernel,
            out_shape=jax.ShapeDtypeStruct((Bp, _OUT_LANES), out_dtype),
            grid=grid,
            in_specs=in_specs,
            out_specs=out_spec,
            scratch_shapes=scratch,
            compiler_params=pltpu.CompilerParams(
                dimension_semantics=dim_sem,
                vmem_limit_bytes=vmem_limit),
        )(x1, x2, w1p, b1p, w2p, b2p, w3a, w3b, b3s)

    try:
        out_padded = run(single_buffer_weights=True)
    except Exception:
        # Fallback for JAX versions where pl.Buffered(1) on top-level
        # pallas_call BlockSpecs is unavailable/rejected: default (correct,
        # double-buffered) pipeline; genuine kernel bugs still surface here.
        out_padded = run(single_buffer_weights=False)

    # TODO(synk): for the tiny-H / huge-B regime, compact 128 batch rows into
    # one lane-dense output row inside the kernel instead of slicing col 0 of
    # the padded slab here.
    return out_padded[:B, :1].astype(jnp.float32)


# ----------------------------------------------------------------------------
# Parameters & references
# ----------------------------------------------------------------------------

def init_params(key, hidden_size):
    """Deterministic synthetic parameters (PyTorch Linear shapes, pre-transposed)."""
    ks = jax.random.split(key, 6)
    scale = 1.0 / jnp.sqrt(hidden_size)
    w1 = jax.random.uniform(ks[0], (hidden_size, hidden_size), jnp.float32, -scale, scale)
    b1 = jax.random.uniform(ks[1], (1, hidden_size), jnp.float32, -scale, scale)
    w2 = jax.random.uniform(ks[2], (hidden_size, hidden_size), jnp.float32, -scale, scale)
    b2 = jax.random.uniform(ks[3], (1, hidden_size), jnp.float32, -scale, scale)
    scale3 = 1.0 / jnp.sqrt(2.0 * hidden_size)
    w3 = jax.random.uniform(ks[4], (2 * hidden_size, 1), jnp.float32, -scale3, scale3)
    b3 = jax.random.uniform(ks[5], (1, 1), jnp.float32, -scale3, scale3)
    return (w1, b1, w2, b2, w3, b3)


def ref_forward_f32(word1, word2, params):
    """Plain-JAX f32 reference, same semantics as the PyTorch forward."""
    w1, b1, w2, b2, w3, b3 = params
    h1 = jnp.maximum(word1 @ w1 + b1, 0.0)
    h2 = jnp.maximum(word2 @ w2 + b2, 0.0)
    return jnp.maximum(jnp.concatenate([h1, h2], axis=1) @ w3 + b3, 0.0)


def ref_forward_matched(word1, word2, params, compute_dtype, out_dtype):
    """Reference mirroring the kernel's bf16-operand / f32-accumulate / bf16-out path."""
    w1, b1, w2, b2, w3, b3 = params
    H = w1.shape[0]
    cd = compute_dtype
    h1 = jnp.maximum(
        jnp.dot(word1.astype(cd), w1.astype(cd), preferred_element_type=jnp.float32) + b1, 0.0)
    h2 = jnp.maximum(
        jnp.dot(word2.astype(cd), w2.astype(cd), preferred_element_type=jnp.float32) + b2, 0.0)
    out = (jnp.dot(h1.astype(cd), w3[:H].astype(cd), preferred_element_type=jnp.float32)
           + jnp.dot(h2.astype(cd), w3[H:].astype(cd), preferred_element_type=jnp.float32))
    return jnp.maximum(out + b3, 0.0).astype(out_dtype).astype(jnp.float32)


# TODO(synk): self.gru (nn.GRU) is instantiated in __init__ but unused in forward;
# it is intentionally not implemented.


if __name__ == "__main__":
    key = jax.random.PRNGKey(0)

    def check(batch, hidden, k_tile):
        k_p, k_x1, k_x2 = jax.random.split(jax.random.fold_in(key, hidden), 3)
        params = init_params(k_p, hidden)
        word1 = jax.random.normal(k_x1, (batch, hidden), jnp.float32)
        word2 = jax.random.normal(k_x2, (batch, hidden), jnp.float32)

        out = detector_forward(word1, word2, params, k_tile=k_tile)
        jax.block_until_ready(out)
        assert out.shape == (batch, 1)

        # Authoritative check: reference that mirrors the kernel's bf16/f32 path
        # (1e-2 tolerance absorbs a possible 1-ULP bf16 output-rounding split).
        ref_m = ref_forward_matched(word1, word2, params, jnp.bfloat16, jnp.bfloat16)
        assert jnp.allclose(out, ref_m, atol=1e-2, rtol=1e-2), \
            f"matched-ref mismatch: {jnp.max(jnp.abs(out - ref_m))}"

        # Semantics check vs the plain f32 PyTorch-equivalent forward;
        # tolerance scales ~sqrt(H) for the bf16-operand rounding.
        tol = 0.05 * math.sqrt(max(hidden, 32) / 32.0)
        ref_f = ref_forward_f32(word1, word2, params)
        assert jnp.allclose(out, ref_f, atol=tol, rtol=tol), \
            f"f32-ref mismatch: {jnp.max(jnp.abs(out - ref_f))}"

    # Small shapes consistent with (batch, hidden_size) inputs:
    check(batch=8, hidden=32, k_tile="auto")      # weights-stationary path
    check(batch=24, hidden=200, k_tile=128)       # forced K-tiled path (2 K steps)

    print("KERNEL_OK")
</pallas_src>

<mosaic_0001>
module attributes {stable_mosaic.version = 11 : i64} {
  func.func @detector_kernel(%arg0: i32, %arg1: memref<8x128xbf16, #tpu.memory_space<vmem>>, %arg2: memref<8x128xbf16, #tpu.memory_space<vmem>>, %arg3: memref<128x128xbf16, #tpu.memory_space<vmem>>, %arg4: memref<1x128xf32, #tpu.memory_space<vmem>>, %arg5: memref<128x128xbf16, #tpu.memory_space<vmem>>, %arg6: memref<1x128xf32, #tpu.memory_space<vmem>>, %arg7: memref<128x128xbf16, #tpu.memory_space<vmem>>, %arg8: memref<128x128xbf16, #tpu.memory_space<vmem>>, %arg9: memref<1x1xf32, #tpu.memory_space<smem>>, %arg10: memref<8x128xbf16, #tpu.memory_space<vmem>>) attributes {dimension_semantics = [#tpu.dimension_semantics<parallel>], iteration_bounds = array<i64: 1>, scalar_prefetch = 0 : i64, scratch_operands = 0 : i64, tpu.core_type = #tpu.core_type<tc>, window_params = [{transform_indices = @transform_0, window_bounds = array<i64: 8, 128>}, {transform_indices = @transform_1, window_bounds = array<i64: 8, 128>}, {pipeline_mode = #tpu.pipeline_mode<synchronous>, transform_indices = @transform_2, window_bounds = array<i64: 128, 128>}, {pipeline_mode = #tpu.pipeline_mode<synchronous>, transform_indices = @transform_3, window_bounds = array<i64: 1, 128>}, {pipeline_mode = #tpu.pipeline_mode<synchronous>, transform_indices = @transform_4, window_bounds = array<i64: 128, 128>}, {pipeline_mode = #tpu.pipeline_mode<synchronous>, transform_indices = @transform_5, window_bounds = array<i64: 1, 128>}, {pipeline_mode = #tpu.pipeline_mode<synchronous>, transform_indices = @transform_6, window_bounds = array<i64: 128, 128>}, {pipeline_mode = #tpu.pipeline_mode<synchronous>, transform_indices = @transform_7, window_bounds = array<i64: 128, 128>}, {transform_indices = @transform_8, window_bounds = array<i64: 1, 1>}, {transform_indices = @transform_9, window_bounds = array<i64: 8, 128>}]} {
    %c0 = arith.constant 0 : index
    %c0_0 = arith.constant 0 : index
    %0 = vector.load %arg1[%c0, %c0_0] : memref<8x128xbf16, #tpu.memory_space<vmem>>, vector<8x128xbf16>
    %c0_1 = arith.constant 0 : index
    %c0_2 = arith.constant 0 : index
    %1 = vector.load %arg3[%c0_1, %c0_2] : memref<128x128xbf16, #tpu.memory_space<vmem>>, vector<128x128xbf16>
    %cst = arith.constant dense<0.000000e+00> : vector<8x128xf32>
    %2 = tpu.matmul %0, %1, %cst {dimension_numbers = #tpu.dot_dimension_numbers<[1], [0], [0], [1], [0, 0, 1, 1], [], []>} : vector<8x128xbf16>, vector<128x128xbf16>, vector<8x128xf32> -> vector<8x128xf32>
    %c0_3 = arith.constant 0 : index
    %c0_4 = arith.constant 0 : index
    %3 = vector.load %arg4[%c0_3, %c0_4] : memref<1x128xf32, #tpu.memory_space<vmem>>, vector<1x128xf32>
    %4 = vector.broadcast %3 : vector<1x128xf32> to vector<8x128xf32>
    %5 = arith.addf %2, %4 : vector<8x128xf32>
    %cst_5 = arith.constant 0.000000e+00 : f32
    %6 = vector.broadcast %cst_5 : f32 to vector<8x128xf32>
    %7 = arith.maximumf %5, %6 : vector<8x128xf32>
    %c0_6 = arith.constant 0 : index
    %c0_7 = arith.constant 0 : index
    %8 = vector.load %arg2[%c0_6, %c0_7] : memref<8x128xbf16, #tpu.memory_space<vmem>>, vector<8x128xbf16>
    %c0_8 = arith.constant 0 : index
    %c0_9 = arith.constant 0 : index
    %9 = vector.load %arg5[%c0_8, %c0_9] : memref<128x128xbf16, #tpu.memory_space<vmem>>, vector<128x128xbf16>
    %cst_10 = arith.constant dense<0.000000e+00> : vector<8x128xf32>
    %10 = tpu.matmul %8, %9, %cst_10 {dimension_numbers = #tpu.dot_dimension_numbers<[1], [0], [0], [1], [0, 0, 1, 1], [], []>} : vector<8x128xbf16>, vector<128x128xbf16>, vector<8x128xf32> -> vector<8x128xf32>
    %c0_11 = arith.constant 0 : index
    %c0_12 = arith.constant 0 : index
    %11 = vector.load %arg6[%c0_11, %c0_12] : memref<1x128xf32, #tpu.memory_space<vmem>>, vector<1x128xf32>
    %12 = vector.broadcast %11 : vector<1x128xf32> to vector<8x128xf32>
    %13 = arith.addf %10, %12 : vector<8x128xf32>
    %cst_13 = arith.constant 0.000000e+00 : f32
    %14 = vector.broadcast %cst_13 : f32 to vector<8x128xf32>
    %15 = arith.maximumf %13, %14 : vector<8x128xf32>
    %16 = arith.truncf %7 : vector<8x128xf32> to vector<8x128xbf16>
    %c0_14 = arith.constant 0 : index
    %c0_15 = arith.constant 0 : index
    %17 = vector.load %arg7[%c0_14, %c0_15] : memref<128x128xbf16, #tpu.memory_space<vmem>>, vector<128x128xbf16>
    %cst_16 = arith.constant dense<0.000000e+00> : vector<8x128xf32>
    %18 = tpu.matmul %16, %17, %cst_16 {dimension_numbers = #tpu.dot_dimension_numbers<[1], [0], [0], [1], [0, 0, 1, 1], [], []>} : vector<8x128xbf16>, vector<128x128xbf16>, vector<8x128xf32> -> vector<8x128xf32>
    %19 = arith.truncf %15 : vector<8x128xf32> to vector<8x128xbf16>
    %c0_17 = arith.constant 0 : index
    %c0_18 = arith.constant 0 : index
    %20 = vector.load %arg8[%c0_17, %c0_18] : memref<128x128xbf16, #tpu.memory_space<vmem>>, vector<128x128xbf16>
    %cst_19 = arith.constant dense<0.000000e+00> : vector<8x128xf32>
    %21 = tpu.matmul %19, %20, %cst_19 {dimension_numbers = #tpu.dot_dimension_numbers<[1], [0], [0], [1], [0, 0, 1, 1], [], []>} : vector<8x128xbf16>, vector<128x128xbf16>, vector<8x128xf32> -> vector<8x128xf32>
    %22 = arith.addf %18, %21 : vector<8x128xf32>
    %c0_20 = arith.constant 0 : index
    %c0_21 = arith.constant 0 : index
    %23 = memref.load %arg9[%c0_20, %c0_21] : memref<1x1xf32, #tpu.memory_space<smem>>
    %24 = vector.broadcast %23 : f32 to vector<8x128xf32>
    %25 = arith.addf %22, %24 : vector<8x128xf32>
    %cst_22 = arith.constant 0.000000e+00 : f32
    %26 = vector.broadcast %cst_22 : f32 to vector<8x128xf32>
    %27 = arith.maximumf %25, %26 : vector<8x128xf32>
    %28 = arith.truncf %27 : vector<8x128xf32> to vector<8x128xbf16>
    %c0_23 = arith.constant 0 : index
    %c0_24 = arith.constant 0 : index
    %29 = vector.load %arg10[%c0_23, %c0_24] : memref<8x128xbf16, #tpu.memory_space<vmem>>, vector<8x128xbf16>
    tpu.vector_store %arg10[%c0_23, %c0_24], %28 {strides = array<i32>} : memref<8x128xbf16, #tpu.memory_space<vmem>>, vector<8x128xbf16>,
    return
  }
  func.func @transform_0(%arg0: i32) -> (i32, i32) {
    %c0_i32 = arith.constant 0 : i32
    %c0_i32_0 = arith.constant 0 : i32
    return %arg0, %c0_i32 : i32, i32
  }
  func.func @transform_1(%arg0: i32) -> (i32, i32) {
    %c0_i32 = arith.constant 0 : i32
    %c0_i32_0 = arith.constant 0 : i32
    return %arg0, %c0_i32 : i32, i32
  }
  func.func @transform_2(%arg0: i32) -> (i32, i32) {
    %c0_i32 = arith.constant 0 : i32
    %c0_i32_0 = arith.constant 0 : i32
    %c0_i32_1 = arith.constant 0 : i32
    return %c0_i32, %c0_i32_0 : i32, i32
  }
  func.func @transform_3(%arg0: i32) -> (i32, i32) {
    %c0_i32 = arith.constant 0 : i32
    %c0_i32_0 = arith.constant 0 : i32
    %c0_i32_1 = arith.constant 0 : i32
    return %c0_i32, %c0_i32_0 : i32, i32
  }
  func.func @transform_4(%arg0: i32) -> (i32, i32) {
    %c0_i32 = arith.constant 0 : i32
    %c0_i32_0 = arith.constant 0 : i32
    %c0_i32_1 = arith.constant 0 : i32
    return %c0_i32, %c0_i32_0 : i32, i32
  }
  func.func @transform_5(%arg0: i32) -> (i32, i32) {
    %c0_i32 = arith.constant 0 : i32
    %c0_i32_0 = arith.constant 0 : i32
    %c0_i32_1 = arith.constant 0 : i32
    return %c0_i32, %c0_i32_0 : i32, i32
  }
  func.func @transform_6(%arg0: i32) -> (i32, i32) {
    %c0_i32 = arith.constant 0 : i32
    %c0_i32_0 = arith.constant 0 : i32
    %c0_i32_1 = arith.constant 0 : i32
    return %c0_i32, %c0_i32_0 : i32, i32
  }
  func.func @transform_7(%arg0: i32) -> (i32, i32) {
    %c0_i32 = arith.constant 0 : i32
    %c0_i32_0 = arith.constant 0 : i32
    %c0_i32_1 = arith.constant 0 : i32
    return %c0_i32, %c0_i32_0 : i32, i32
  }
  func.func @transform_8(%arg0: i32) -> (i32, i32) {
    %c0_i32 = arith.constant 0 : i32
    %c0_i32_0 = arith.constant 0 : i32
    %c0_i32_1 = arith.constant 0 : i32
    return %c0_i32, %c0_i32_0 : i32, i32
  }
  func.func @transform_9(%arg0: i32) -> (i32, i32) {
    %c0_i32 = arith.constant 0 : i32
    %c0_i32_0 = arith.constant 0 : i32
    return %arg0, %c0_i32 : i32, i32
  }
}

module attributes {stable_mosaic.version = 11 : i64} {
  func.func @detector_kernel(%arg0: i32, %arg1: memref<8x128xbf16, #tpu.memory_space<vmem>>, %arg2: memref<8x128xbf16, #tpu.memory_space<vmem>>, %arg3: memref<128x128xbf16, #tpu.memory_space<vmem>>, %arg4: memref<1x128xf32, #tpu.memory_space<vmem>>, %arg5: memref<128x128xbf16, #tpu.memory_space<vmem>>, %arg6: memref<1x128xf32, #tpu.memory_space<vmem>>, %arg7: memref<128x128xbf16, #tpu.memory_space<vmem>>, %arg8: memref<128x128xbf16, #tpu.memory_space<vmem>>, %arg9: memref<1x1xf32, #tpu.memory_space<smem>>, %arg10: memref<8x128xbf16, #tpu.memory_space<vmem>>) attributes {dimension_semantics = [#tpu.dimension_semantics<parallel>], iteration_bounds = array<i64: 1>, scalar_prefetch = 0 : i64, scratch_operands = 0 : i64, tpu.core_type = #tpu.core_type<tc>, window_params = [{transform_indices = @transform_0, window_bounds = array<i64: 8, 128>}, {transform_indices = @transform_1, window_bounds = array<i64: 8, 128>}, {pipeline_mode = #tpu.pipeline_mode<synchronous>, transform_indices = @transform_2, window_bounds = array<i64: 128, 128>}, {pipeline_mode = #tpu.pipeline_mode<synchronous>, transform_indices = @transform_3, window_bounds = array<i64: 1, 128>}, {pipeline_mode = #tpu.pipeline_mode<synchronous>, transform_indices = @transform_4, window_bounds = array<i64: 128, 128>}, {pipeline_mode = #tpu.pipeline_mode<synchronous>, transform_indices = @transform_5, window_bounds = array<i64: 1, 128>}, {pipeline_mode = #tpu.pipeline_mode<synchronous>, transform_indices = @transform_6, window_bounds = array<i64: 128, 128>}, {pipeline_mode = #tpu.pipeline_mode<synchronous>, transform_indices = @transform_7, window_bounds = array<i64: 128, 128>}, {transform_indices = @transform_8, window_bounds = array<i64: 1, 1>}, {transform_indices = @transform_9, window_bounds = array<i64: 8, 128>}]} {
    %c0 = arith.constant 0 : index
    %c0_0 = arith.constant 0 : index
    %0 = vector.load %arg1[%c0, %c0_0] : memref<8x128xbf16, #tpu.memory_space<vmem>>, vector<8x128xbf16>
    %c0_1 = arith.constant 0 : index
    %c0_2 = arith.constant 0 : index
    %1 = vector.load %arg3[%c0_1, %c0_2] : memref<128x128xbf16, #tpu.memory_space<vmem>>, vector<128x128xbf16>
    %cst = arith.constant dense<0.000000e+00> : vector<8x128xf32>
    %2 = tpu.matmul %0, %1, %cst {dimension_numbers = #tpu.dot_dimension_numbers<[1], [0], [0], [1], [0, 0, 1, 1], [], []>} : vector<8x128xbf16>, vector<128x128xbf16>, vector<8x128xf32> -> vector<8x128xf32>
    %c0_3 = arith.constant 0 : index
    %c0_4 = arith.constant 0 : index
    %3 = vector.load %arg4[%c0_3, %c0_4] : memref<1x128xf32, #tpu.memory_space<vmem>>, vector<1x128xf32>
    %4 = vector.broadcast %3 : vector<1x128xf32> to vector<8x128xf32>
    %5 = arith.addf %2, %4 : vector<8x128xf32>
    %cst_5 = arith.constant 0.000000e+00 : f32
    %6 = vector.broadcast %cst_5 : f32 to vector<8x128xf32>
    %7 = arith.maximumf %5, %6 : vector<8x128xf32>
    %c0_6 = arith.constant 0 : index
    %c0_7 = arith.constant 0 : index
    %8 = vector.load %arg2[%c0_6, %c0_7] : memref<8x128xbf16, #tpu.memory_space<vmem>>, vector<8x128xbf16>
    %c0_8 = arith.constant 0 : index
    %c0_9 = arith.constant 0 : index
    %9 = vector.load %arg5[%c0_8, %c0_9] : memref<128x128xbf16, #tpu.memory_space<vmem>>, vector<128x128xbf16>
    %cst_10 = arith.constant dense<0.000000e+00> : vector<8x128xf32>
    %10 = tpu.matmul %8, %9, %cst_10 {dimension_numbers = #tpu.dot_dimension_numbers<[1], [0], [0], [1], [0, 0, 1, 1], [], []>} : vector<8x128xbf16>, vector<128x128xbf16>, vector<8x128xf32> -> vector<8x128xf32>
    %c0_11 = arith.constant 0 : index
    %c0_12 = arith.constant 0 : index
    %11 = vector.load %arg6[%c0_11, %c0_12] : memref<1x128xf32, #tpu.memory_space<vmem>>, vector<1x128xf32>
    %12 = vector.broadcast %11 : vector<1x128xf32> to vector<8x128xf32>
    %13 = arith.addf %10, %12 : vector<8x128xf32>
    %cst_13 = arith.constant 0.000000e+00 : f32
    %14 = vector.broadcast %cst_13 : f32 to vector<8x128xf32>
    %15 = arith.maximumf %13, %14 : vector<8x128xf32>
    %16 = arith.truncf %7 : vector<8x128xf32> to vector<8x128xbf16>
    %c0_14 = arith.constant 0 : index
    %c0_15 = arith.constant 0 : index
    %17 = vector.load %arg7[%c0_14, %c0_15] : memref<128x128xbf16, #tpu.memory_space<vmem>>, vector<128x128xbf16>
    %cst_16 = arith.constant dense<0.000000e+00> : vector<8x128xf32>
    %18 = tpu.matmul %16, %17, %cst_16 {dimension_numbers = #tpu.dot_dimension_numbers<[1], [0], [0], [1], [0, 0, 1, 1], [], []>} : vector<8x128xbf16>, vector<128x128xbf16>, vector<8x128xf32> -> vector<8x128xf32>
    %19 = arith.truncf %15 : vector<8x128xf32> to vector<8x128xbf16>
    %c0_17 = arith.constant 0 : index
    %c0_18 = arith.constant 0 : index
    %20 = vector.load %arg8[%c0_17, %c0_18] : memref<128x128xbf16, #tpu.memory_space<vmem>>, vector<128x128xbf16>
    %cst_19 = arith.constant dense<0.000000e+00> : vector<8x128xf32>
    %21 = tpu.matmul %19, %20, %cst_19 {dimension_numbers = #tpu.dot_dimension_numbers<[1], [0], [0], [1], [0, 0, 1, 1], [], []>} : vector<8x128xbf16>, vector<128x128xbf16>, vector<8x128xf32> -> vector<8x128xf32>
    %22 = arith.addf %18, %21 : vector<8x128xf32>
    %c0_20 = arith.constant 0 : index
    %c0_21 = arith.constant 0 : index
    %23 = memref.load %arg9[%c0_20, %c0_21] : memref<1x1xf32, #tpu.memory_space<smem>>
    %24 = vector.broadcast %23 : f32 to vector<8x128xf32>
    %25 = arith.addf %22, %24 : vector<8x128xf32>
    %cst_22 = arith.constant 0.000000e+00 : f32
    %26 = vector.broadcast %cst_22 : f32 to vector<8x128xf32>
    %27 = arith.maximumf %25, %26 : vector<8x128xf32>
    %28 = arith.truncf %27 : vector<8x128xf32> to vector<8x128xbf16>
    %c0_23 = arith.constant 0 : index
    %c0_24 = arith.constant 0 : index
    %29 = vector.load %arg10[%c0_23, %c0_24] : memref<8x128xbf16, #tpu.memory_space<vmem>>, vector<8x128xbf16>
    tpu.vector_store %arg10[%c0_23, %c0_24], %28 {strides = array<i32>} : memref<8x128xbf16, #tpu.memory_space<vmem>>, vector<8x128xbf16>,
    return
  }
  func.func @transform_0(%arg0: i32) -> (i32, i32) {
    %c0_i32 = arith.constant 0 : i32
    %c0_i32_0 = arith.constant 0 : i32
    return %arg0, %c0_i32 : i32, i32
  }
  func.func @transform_1(%arg0: i32) -> (i32, i32) {
    %c0_i32 = arith.constant 0 : i32
    %c0_i32_0 = arith.constant 0 : i32
    return %arg0, %c0_i32 : i32, i32
  }
  func.func @transform_2(%arg0: i32) -> (i32, i32) {
    %c0_i32 = arith.constant 0 : i32
    %c0_i32_0 = arith.constant 0 : i32
    %c0_i32_1 = arith.constant 0 : i32
    return %c0_i32, %c0_i32_0 : i32, i32
  }
  func.func @transform_3(%arg0: i32) -> (i32, i32) {
    %c0_i32 = arith.constant 0 : i32
    %c0_i32_0 = arith.constant 0 : i32
    %c0_i32_1 = arith.constant 0 : i32
    return %c0_i32, %c0_i32_0 : i32, i32
  }
  func.func @transform_4(%arg0: i32) -> (i32, i32) {
    %c0_i32 = arith.constant 0 : i32
    %c0_i32_0 = arith.constant 0 : i32
    %c0_i32_1 = arith.constant 0 : i32
    return %c0_i32, %c0_i32_0 : i32, i32
  }
  func.func @transform_5(%arg0: i32) -> (i32, i32) {
    %c0_i32 = arith.constant 0 : i32
    %c0_i32_0 = arith.constant 0 : i32
    %c0_i32_1 = arith.constant 0 : i32
    return %c0_i32, %c0_i32_0 : i32, i32
  }
  func.func @transform_6(%arg0: i32) -> (i32, i32) {
    %c0_i32 = arith.constant 0 : i32
    %c0_i32_0 = arith.constant 0 : i32
    %c0_i32_1 = arith.constant 0 : i32
    return %c0_i32, %c0_i32_0 : i32, i32
  }
  func.func @transform_7(%arg0: i32) -> (i32, i32) {
    %c0_i32 = arith.constant 0 : i32
    %c0_i32_0 = arith.constant 0 : i32
    %c0_i32_1 = arith.constant 0 : i32
    return %c0_i32, %c0_i32_0 : i32, i32
  }
  func.func @transform_8(%arg0: i32) -> (i32, i32) {
    %c0_i32 = arith.constant 0 : i32
    %c0_i32_0 = arith.constant 0 : i32
    %c0_i32_1 = arith.constant 0 : i32
    return %c0_i32, %c0_i32_0 : i32, i32
  }
  func.func @transform_9(%arg0: i32) -> (i32, i32) {
    %c0_i32 = arith.constant 0 : i32
    %c0_i32_0 = arith.constant 0 : i32
    return %arg0, %c0_i32 : i32, i32
  }
}

</mosaic_0001>

<bundles_post_ra>
// kernel: tpu_custom_call.1
= control target key start
LH: loop header
LB: loop body
LE: loop exit
PB: predicated region body
PF: predicated region fallthrough
CT: control target
= control target key end

     0   :  { %15 = vsyncpa [#allocation4], 0  ;;  %s1088_s0 = inlined_call_operand.hbm [shape: bf16[8,128], index: 0, kind: input, shape index: {}]   ;;  %s1089_s1 = inlined_call_operand.vmem [shape: bf16[8,128], index: 1, kind: input, shape index: {}]   ;;  %s1090_s2 = inlined_call_operand.hbm [shape: bf16[128,128], index: 2, kind: input, shape index: {}]   ;;  %s1091_s3 = inlined_call_operand.vmem [shape: f32[1,128], index: 3, kind: input, shape index: {}]   ;;  %s1092_s4 = inlined_call_operand.hbm [shape: bf16[128,128], index: 4, kind: input, shape index: {}]   ;;  %s1093_s5 = inlined_call_operand.vmem [shape: f32[1,128], index: 5, kind: input, shape index: {}]   ;;  %s1094_s6 = inlined_call_operand.hbm [shape: bf16[128,128], index: 6, kind: input, shape index: {}]   ;;  %s1095_s7 = inlined_call_operand.hbm [shape: bf16[128,128], index: 7, kind: input, shape index: {}]   ;;  %s1096_s8 = inlined_call_operand.<no memory space> [shape: f32[1,1], index: 8, kind: input, shape index: {}]   ;;  %s1097_s9 = inlined_call_operand.hbm [shape: bf16[8,128], index: 9, kind: output, shape index: {}]  }
   0x1   :  { %16 = vsyncpa [#allocation7], 0 }
   0x2   :  { %17 = vsyncpa [#allocation10], 0 }
   0x3   :  { %18 = vsyncpa [#allocation5], 0  ;;  %s892_s30 = smov [#allocation6]   ;;  %s752_s13 = scalar_lea.hbm %s1090_s2, 1024 }
   0x4   :  { %s36_s10 = sshll.u32 %s892_s30, 4  ;;  %p753_p0 = scmp.ne.s32.totalorder %s1090_s2, %s752_s13  ;;  %s37_s10 = int_to_ptr.vmem [resolvable:$true] %s36_s10 }
   0x5   :  { %p756_p1 = scmp.lt.u32.totalorder %s752_s13, %s1090_s2 }
   0x7   :  { %p758_p2 = pnand %p756_p1, %p753_p0 }
   0x9   :  { %761 = shalt.err (!%p758_p2)
}
   0xa   :  { %s762_s18 = scalar_lea.vmem %s37_s10, 1024  ;;  %p767_p4 = scmp.lt.s32.totalorder %s37_s10, %s37_s10 }
   0xb   :  { %p763_p3 = scmp.ne.s32.totalorder %s37_s10, %s762_s18  ;;  %p768_p5 = scmp.lt.s32.totalorder %s762_s18, %s762_s18 }
   0xd   :  { %p769_p6 = por %p768_p5, %p767_p4 }
   0xf   :  { %p770_p7 = pnand %p769_p6, %p763_p3 }
  0x11   :  { %773 = shalt.err (!%p770_p7)
}
  0x12   :  { %s893_s19 = smov 64   ;;  %s894_s20 = smov 4  }
  0x13   :  { %42 = dma.hbm_to_vmem [thread:$0]  %s1090_s2, 1024, %s37_s10, [#allocation7], %s893_s19, %s893_s19, %s894_s20  }
  0x14   :  { %s895_s23 = smov [#allocation9]   ;;  %s896_s25 = smov [#allocation3]  }
  0x15   :  { %s64_s24 = sshll.u32 %s895_s23, 4  ;;  %s25_s26 = sshll.u32 %s896_s25, 4  ;;  %s65_s24 = int_to_ptr.vmem [resolvable:$true] %s64_s24  ;;  %s26_s26 = int_to_ptr.vmem [resolvable:$true] %s25_s26 }
  0x16   :  { %s774_s29 = scalar_lea.hbm %s1094_s6, 1024 }
  0x17   :  { %p775_p8 = scmp.ne.s32.totalorder %s1094_s6, %s774_s29  ;;  %p778_p9 = scmp.lt.u32.totalorder %s774_s29, %s1094_s6 }
  0x19   :  { %p780_p10 = pnand %p778_p9, %p775_p8 }
  0x1b   :  { %783 = shalt.err (!%p780_p10)
}
  0x1c   :  { %s784_s2 = scalar_lea.vmem %s65_s24, 1024  ;;  %p789_p12 = scmp.lt.s32.totalorder %s65_s24, %s65_s24 }
  0x1d   :  { %p785_p11 = scmp.ne.s32.totalorder %s65_s24, %s784_s2  ;;  %p790_p13 = scmp.lt.s32.totalorder %s784_s2, %s784_s2 }
  0x1f   :  { %p791_p0 = por %p790_p13, %p789_p12 }
  0x21   :  { %p792_p1 = pnand %p791_p0, %p785_p11 }
  0x23   :  { %795 = shalt.err (!%p792_p1)
}
  0x24   :  { %70 = dma.hbm_to_vmem [thread:$0]  %s1094_s6, 1024, %s65_s24, [#allocation10], %s893_s19, %s893_s19, %s894_s20  }
  0x25   :  { %s796_s17 = scalar_lea.hbm %s1088_s0, 64 }
  0x26   :  { %p797_p2 = scmp.ne.s32.totalorder %s1088_s0, %s796_s17  ;;  %p800_p3 = scmp.lt.u32.totalorder %s796_s17, %s1088_s0 }
  0x28   :  { %p802_p4 = pnand %p800_p3, %p797_p2 }
  0x2a   :  { %805 = shalt.err (!%p802_p4)
}
  0x2b   :  { %s806_s25 = scalar_lea.vmem %s26_s26, 64  ;;  %p811_p6 = scmp.lt.s32.totalorder %s26_s26, %s26_s26 }
  0x2c   :  { %p807_p5 = scmp.ne.s32.totalorder %s26_s26, %s806_s25  ;;  %p812_p7 = scmp.lt.s32.totalorder %s806_s25, %s806_s25 }
  0x2e   :  { %p813_p8 = por %p812_p7, %p811_p6 }
  0x30   :  { %p814_p9 = pnand %p813_p8, %p807_p5 }
  0x32   :  { %817 = shalt.err (!%p814_p9)
}
  0x33   :  { %28 = dma.hbm_to_vmem [thread:$0]  %s1088_s0, 64, %s26_s26, [#allocation4]  }
  0x34   :  { %s897_s27 = smov [#allocation8]   ;;  %s898_s29 = smov [#allocation11]  }
  0x35   :  { %s50_s28 = sshll.u32 %s897_s27, 4  ;;  %s76_s30 = sshll.u32 %s898_s29, 4  ;;  %s51_s28 = int_to_ptr.vmem [resolvable:$true] %s50_s28  ;;  %s77_s30 = int_to_ptr.vmem [resolvable:$true] %s76_s30 }
  0x36   :  { %s818_s13 = scalar_lea.hbm %s1092_s4, 1024 }
  0x37   :  { %p819_p10 = scmp.ne.s32.totalorder %s1092_s4, %s818_s13  ;;  %p822_p11 = scmp.lt.u32.totalorder %s818_s13, %s1092_s4 }
  0x39   :  { %p824_p12 = pnand %p822_p11, %p819_p10 }
  0x3b   :  { %827 = shalt.err (!%p824_p12)
}
  0x3c   :  { %s828_s0 = scalar_lea.vmem %s51_s28, 1024  ;;  %p833_p0 = scmp.lt.s32.totalorder %s51_s28, %s51_s28 }
  0x3d   :  { %p829_p13 = scmp.ne.s32.totalorder %s51_s28, %s828_s0  ;;  %p834_p1 = scmp.lt.s32.totalorder %s828_s0, %s828_s0 }
  0x3f   :  { %p835_p2 = por %p834_p1, %p833_p0 }
  0x41   :  { %p836_p3 = pnand %p835_p2, %p829_p13 }
  0x43   :  { %839 = shalt.err (!%p836_p3)
}
  0x44   :  { %56 = dma.hbm_to_vmem [thread:$0]  %s1092_s4, 1024, %s51_s28, [#allocation7], %s893_s19, %s893_s19, %s894_s20  }
  0x45   :  { %s840_s21 = scalar_lea.hbm %s1095_s7, 1024 }
  0x46   :  { %p841_p4 = scmp.ne.s32.totalorder %s1095_s7, %s840_s21  ;;  %p844_p5 = scmp.lt.u32.totalorder %s840_s21, %s1095_s7 }
  0x48   :  { %p846_p6 = pnand %p844_p5, %p841_p4 }
  0x4a   :  { %849 = shalt.err (!%p846_p6)
}
  0x4b   :  { %s850_s24 = scalar_lea.vmem %s77_s30, 1024  ;;  %p855_p8 = scmp.lt.s32.totalorder %s77_s30, %s77_s30 }
  0x4c   :  { %p851_p7 = scmp.ne.s32.totalorder %s77_s30, %s850_s24  ;;  %p856_p9 = scmp.lt.s32.totalorder %s850_s24, %s850_s24 }
  0x4e   :  { %p857_p10 = por %p856_p9, %p855_p8 }
  0x50   :  { %p858_p11 = pnand %p857_p10, %p851_p7 }
  0x52   :  { %861 = shalt.err (!%p858_p11)
}
  0x53   :  { %82 = dma.hbm_to_vmem [thread:$0]  %s1095_s7, 1024, %s77_s30, [#allocation10], %s893_s19, %s893_s19, %s894_s20  }
  0x54   :  { %884 = dma.done.wait [#allocation4], 64  }
  0x55   :  { %885 = vsyncadd [#allocation4], 4294967232 }
  0x56   :  { %886 = dma.done.wait [#allocation7], 2048  }
  0x57   :  { %887 = vsyncadd [#allocation7], 4294965248 }
  0x58   :  { %888 = dma.done.wait [#allocation10], 2048  }
  0x59   :  { %889 = vsyncadd [#allocation10], 4294965248  ;;  %v899_v0 = vmov 0.0   ;;  %vm900_vm0 = vmmov 0   ;;  %v720_v1 = vld [vmem:[#allocation6] sm:$0xff]   ;;  %v722_v3 = vld [vmem:[#allocation6 + $0x8] sm:$0xff]   ;;  %v538_v53 = vstv %s1096_s8 }
  0x5a   :  { %630 = vmatprep.subr.bf16.mxu0 %v899_v0  ;;  %650 = vmatprep.subr.bf16.mxu1 %v899_v0  ;;  %v721_v2 = vld [vmem:[#allocation8] sm:$0xff]   ;;  %v723_v4 = vld [vmem:[#allocation8 + $0x8] sm:$0xff]   ;;  %v724_v5 = vld [vmem:[#allocation6 + $0x10] sm:$0xff]   ;;  %s901_s30 = smov [#allocation12]  }
  0x5b   :  { %646 = vmatprep.mubr.msk.bf16.mxu0 %vm900_vm0, %v899_v0  ;;  %666 = vmatprep.mubr.msk.bf16.mxu1 %vm900_vm0, %v899_v0  ;;  %v725_v6 = vld [vmem:[#allocation8 + $0x10] sm:$0xff]   ;;  %v726_v7 = vld [vmem:[#allocation6 + $0x18] sm:$0xff]   ;;  %v728_v9 = vld [vmem:[#allocation6 + $0x20] sm:$0xff]   ;;  %s549_s11 = sshll.u32 %s901_s30, 4  ;;  %s550_s11 = int_to_ptr.vmem [resolvable:$true] %s549_s11 }
  0x5c   :  { %631 = vmatpush3.bf16.msra.mxu0 %v720_v1  ;;  %651 = vmatpush3.bf16.msra.mxu1 %v721_v2  ;;  %v727_v8 = vld [vmem:[#allocation8 + $0x18] sm:$0xff]   ;;  %v729_v10 = vld [vmem:[#allocation8 + $0x20] sm:$0xff]   ;;  %v730_v11 = vld [vmem:[#allocation6 + $0x28] sm:$0xff]   ;;  %s862_s12 = scalar_lea.vmem %s550_s11, 64  ;;  %p867_p13 = scmp.lt.s32.totalorder %s550_s11, %s550_s11 }
  0x5d   :  { %632 = vmatprep.subr.bf16.mxu0 %v899_v0  ;;  %652 = vmatprep.subr.bf16.mxu1 %v899_v0  ;;  %v731_v12 = vld [vmem:[#allocation8 + $0x28] sm:$0xff]   ;;  %v732_v13 = vld [vmem:[#allocation6 + $0x30] sm:$0xff]   ;;  %v734_v15 = vld [vmem:[#allocation6 + $0x38] sm:$0xff]   ;;  %p863_p12 = scmp.ne.s32.totalorder %s550_s11, %s862_s12  ;;  %p868_p0 = scmp.lt.s32.totalorder %s862_s12, %s862_s12 }
  0x5e   :  { %v733_v14 = vld [vmem:[#allocation8 + $0x30] sm:$0xff]   ;;  %v735_v16 = vld [vmem:[#allocation8 + $0x38] sm:$0xff]   ;;  %v736_v18 = vld [vmem:[#allocation11] sm:$0xff]  }
  0x5f   :  { %v101_v17 = vld [vmem:[#allocation3] sm:$0xf]  ;;  %v737_v20 = vld [vmem:[#allocation9] sm:$0xff]   ;;  %v738_v21 = vld [vmem:[#allocation11 + $0x8] sm:$0xff]   ;;  %p869_p1 = por %p868_p0, %p867_p13 }
  0x60   :  { %633 = vmatpush3.bf16.msra.mxu0 %v722_v3  ;;  %653 = vmatpush3.bf16.msra.mxu1 %v723_v4  ;;  %v214_v19 = vld [vmem:[%s1089_s1] sm:$0xf]  ;;  %v739_v22 = vld [vmem:[#allocation9 + $0x8] sm:$0xff]   ;;  %v740_v23 = vld [vmem:[#allocation11 + $0x10] sm:$0xff]  }
  0x61   :  { %634 = vmatprep.subr.bf16.mxu0 %v899_v0  ;;  %654 = vmatprep.subr.bf16.mxu1 %v899_v0  ;;  %v741_v24 = vld [vmem:[#allocation9 + $0x10] sm:$0xff]   ;;  %v742_v25 = vld [vmem:[#allocation11 + $0x18] sm:$0xff]   ;;  %v744_v27 = vld [vmem:[#allocation11 + $0x20] sm:$0xff]   ;;  %p870_p2 = pnand %p869_p1, %p863_p12 }
  0x62   :  { %v743_v26 = vld [vmem:[#allocation9 + $0x18] sm:$0xff]   ;;  %v745_v28 = vld [vmem:[#allocation9 + $0x20] sm:$0xff]   ;;  %v746_v29 = vld [vmem:[#allocation11 + $0x28] sm:$0xff]  }
  0x63   :  { %v747_v30 = vld [vmem:[#allocation9 + $0x28] sm:$0xff]   ;;  %v748_v31 = vld [vmem:[#allocation11 + $0x30] sm:$0xff]   ;;  %v750_v33 = vld [vmem:[#allocation11 + $0x38] sm:$0xff]  }
  0x64   :  { %635 = vmatpush3.bf16.msra.mxu0 %v724_v5  ;;  %655 = vmatpush3.bf16.msra.mxu1 %v725_v6  ;;  %v749_v32 = vld [vmem:[#allocation9 + $0x30] sm:$0xff]   ;;  %v751_v34 = vld [vmem:[#allocation9 + $0x38] sm:$0xff]  }
  0x65   :  { %636 = vmatprep.subr.bf16.mxu0 %v899_v0  ;;  %656 = vmatprep.subr.bf16.mxu1 %v899_v0  ;;  %v560_v35 = vld [vmem:[%s1091_s3] ss:$0 sm:$0xff] }
  0x66   :  { %v569_v36 = vld [vmem:[%s1093_s5] ss:$0 sm:$0xff] }
  0x68   :  { %637 = vmatpush3.bf16.msra.mxu0 %v726_v7  ;;  %657 = vmatpush3.bf16.msra.mxu1 %v727_v8 }
  0x69   :  { %638 = vmatprep.subr.bf16.mxu0 %v899_v0  ;;  %658 = vmatprep.subr.bf16.mxu1 %v899_v0 }
  0x6c   :  { %639 = vmatpush3.bf16.msra.mxu0 %v728_v9  ;;  %659 = vmatpush3.bf16.msra.mxu1 %v729_v10 }
  0x6d   :  { %640 = vmatprep.subr.bf16.mxu0 %v899_v0  ;;  %660 = vmatprep.subr.bf16.mxu1 %v899_v0 }
  0x70   :  { %641 = vmatpush3.bf16.msra.mxu0 %v730_v11  ;;  %661 = vmatpush3.bf16.msra.mxu1 %v731_v12 }
  0x71   :  { %642 = vmatprep.subr.bf16.mxu0 %v899_v0  ;;  %662 = vmatprep.subr.bf16.mxu1 %v899_v0 }
  0x74   :  { %643 = vmatpush3.bf16.msra.mxu0 %v732_v13  ;;  %663 = vmatpush3.bf16.msra.mxu1 %v733_v14 }
  0x75   :  { %644 = vmatprep.subr.bf16.mxu0 %v899_v0  ;;  %664 = vmatprep.subr.bf16.mxu1 %v899_v0 }
  0x78   :  { %645 = vmatpush3.bf16.msra.mxu0 %v734_v15  ;;  %665 = vmatpush3.bf16.msra.mxu1 %v735_v16 }
  0x79   :  { %670 = vmatprep.subr.bf16.mxu0 %v899_v0  ;;  %690 = vmatprep.subr.bf16.mxu1 %v899_v0 }
  0x7b   :  { %647 = vmatmul.mubr.bf16.vlgmr.msra.gmra.mrb[0].mxu0 %v101_v17  ;;  %667 = vmatmul.mubr.bf16.vlgmr.msra.gmra.mrb[0].mxu1 %v214_v19 }
  0x7c   :  { %671 = vmatpush3.bf16.msra.mxu0 %v736_v18  ;;  %691 = vmatpush3.bf16.msra.mxu1 %v737_v20 }
  0x7d   :  { %672 = vmatprep.subr.bf16.mxu0 %v899_v0  ;;  %692 = vmatprep.subr.bf16.mxu1 %v899_v0 }
  0x7e   :  { %686 = vmatprep.mubr.msk.bf16.mxu0 %vm900_vm0, %v899_v0  ;;  %706 = vmatprep.mubr.msk.bf16.mxu1 %vm900_vm0, %v899_v0 }
  0x80   :  { %673 = vmatpush3.bf16.msra.mxu0 %v738_v21  ;;  %693 = vmatpush3.bf16.msra.mxu1 %v739_v22 }
  0x81   :  { %674 = vmatprep.subr.bf16.mxu0 %v899_v0  ;;  %694 = vmatprep.subr.bf16.mxu1 %v899_v0 }
  0x84   :  { %675 = vmatpush3.bf16.msra.mxu0 %v740_v23  ;;  %695 = vmatpush3.bf16.msra.mxu1 %v741_v24 }
  0x85   :  { %676 = vmatprep.subr.bf16.mxu0 %v899_v0  ;;  %696 = vmatprep.subr.bf16.mxu1 %v899_v0 }
  0x88   :  { %677 = vmatpush3.bf16.msra.mxu0 %v742_v25  ;;  %697 = vmatpush3.bf16.msra.mxu1 %v743_v26 }
  0x89   :  { %678 = vmatprep.subr.bf16.mxu0 %v899_v0  ;;  %698 = vmatprep.subr.bf16.mxu1 %v899_v0 }
  0x8c   :  { %679 = vmatpush3.bf16.msra.mxu0 %v744_v27  ;;  %699 = vmatpush3.bf16.msra.mxu1 %v745_v28 }
  0x8d   :  { %680 = vmatprep.subr.bf16.mxu0 %v899_v0  ;;  %700 = vmatprep.subr.bf16.mxu1 %v899_v0 }
  0x90   :  { %681 = vmatpush3.bf16.msra.mxu0 %v746_v29  ;;  %701 = vmatpush3.bf16.msra.mxu1 %v747_v30 }
  0x91   :  { %682 = vmatprep.subr.bf16.mxu0 %v899_v0  ;;  %702 = vmatprep.subr.bf16.mxu1 %v899_v0 }
  0x94   :  { %683 = vmatpush3.bf16.msra.mxu0 %v748_v31  ;;  %703 = vmatpush3.bf16.msra.mxu1 %v749_v32 }
  0x95   :  { %684 = vmatprep.subr.bf16.mxu0 %v899_v0  ;;  %704 = vmatprep.subr.bf16.mxu1 %v899_v0 }
  0x98   :  { %685 = vmatpush3.bf16.msra.mxu0 %v750_v33  ;;  %705 = vmatpush3.bf16.msra.mxu1 %v751_v34 }
 0x14e   :  { %v207_v37 = vpop.f32.mrb[0].mxu0  ;;  %v320_v39 = vpop.f32.mrb[0].mxu1 }
 0x14f   :  { %v208_v38 = vadd.f32 %v560_v35, %v207_v37  ;;  %v648_v40 = vpop.f32.mrb[1].mxu0  ;;  %v321_v41 = vadd.f32 %v569_v36, %v320_v39  ;;  %v668_v42 = vpop.f32.mrb[1].mxu1 }
 0x150   :  { %v210_v43 = vpop.f32.mrb[2].mxu0  ;;  %v323_v45 = vpop.f32.mrb[2].mxu1 }
 0x151   :  { %v213_v44 = vmax.f32 %v208_v38, 0.0  ;;  %v649_v46 = vpop.f32.mrb[3].mxu0  ;;  %v326_v47 = vmax.f32 %v321_v41, 0.0  ;;  %v669_v48 = vpop.f32.mrb[3].mxu1 }
 0x153   :  { %v327_v49 = vpack.c.bf16 %v213_v44, %v213_v44  ;;  %v344_v50 = vpack.c.bf16 %v326_v47, %v326_v47 }
 0x155   :  { %707 = vmatmul.mubr.bf16.vlgmr.msra.gmra.mrb[4].mxu1 %v327_v49  ;;  %687 = vmatmul.mubr.bf16.vlgmr.msra.gmra.mrb[4].mxu0 %v344_v50 }
 0x228   :  { %v531_v51 = vpop.f32.mrb[4].mxu1  ;;  %v443_v52 = vpop.f32.mrb[4].mxu0 }
 0x229   :  { %v708_v54 = vpop.f32.mrb[5].mxu1  ;;  %v532_v55 = vadd.f32 %v531_v51, %v443_v52  ;;  %v688_v56 = vpop.f32.mrb[5].mxu0 }
 0x22a   :  { %v534_v57 = vpop.f32.mrb[6].mxu1  ;;  %v446_v58 = vpop.f32.mrb[6].mxu0 }
 0x22b   :  { %v709_v59 = vpop.f32.mrb[7].mxu1  ;;  %v539_v60 = vadd.f32 %v538_v53, %v532_v55  ;;  %v689_v61 = vpop.f32.mrb[7].mxu0 }
 0x22d   :  { %v540_v62 = vmax.f32 %v539_v60, 0.0 }
 0x22f   :  { %v541_v63 = vpack.c.bf16 %v540_v62, %v540_v62 }
 0x231   :  { %542 = vst [vmem:[#allocation12] sm:$0xf] %v541_v63 }
 0x232   :  { %873 = shalt.err (!%p870_p2)
}
 0x233   :  { %s874_s2 = scalar_lea.hbm %s1097_s9, 64 }
 0x234   :  { %p875_p3 = scmp.ne.s32.totalorder %s1097_s9, %s874_s2  ;;  %p878_p4 = scmp.lt.u32.totalorder %s874_s2, %s1097_s9 }
 0x236   :  { %p880_p5 = pnand %p878_p4, %p875_p3 }
 0x238   :  { %883 = shalt.err (!%p880_p5)
}
 0x239   :  { %552 = dma.vmem_to_hbm [thread:$0]  %s550_s11, 64, %s1097_s9, [#allocation5]  }
 0x23a   :  { %890 = dma.done.wait [#allocation5], 64  }
 0x23b   :  { %891 = vsyncadd [#allocation5], 4294967232 }
 0x23c   :  { %556 = vsyncpa [#allocation4], 1 }
 0x23d   :  { %557 = vsyncpa [#allocation7], 1 }
 0x23e   :  { %558 = vsyncpa [#allocation10], 1 }
 0x23f   :  { %559 = vsyncpa [#allocation5], 1 }

// kernel: tpu_custom_call.1
= control target key start
LH: loop header
LB: loop body
LE: loop exit
PB: predicated region body
PF: predicated region fallthrough
CT: control target
= control target key end

     0   :  { %15 = vsyncpa [#allocation4], 0  ;;  %s1088_s0 = inlined_call_operand.hbm [shape: bf16[8,128], index: 0, kind: input, shape index: {}]   ;;  %s1089_s1 = inlined_call_operand.vmem [shape: bf16[8,128], index: 1, kind: input, shape index: {}]   ;;  %s1090_s2 = inlined_call_operand.hbm [shape: bf16[128,128], index: 2, kind: input, shape index: {}]   ;;  %s1091_s3 = inlined_call_operand.vmem [shape: f32[1,128], index: 3, kind: input, shape index: {}]   ;;  %s1092_s4 = inlined_call_operand.hbm [shape: bf16[128,128], index: 4, kind: input, shape index: {}]   ;;  %s1093_s5 = inlined_call_operand.vmem [shape: f32[1,128], index: 5, kind: input, shape index: {}]   ;;  %s1094_s6 = inlined_call_operand.hbm [shape: bf16[128,128], index: 6, kind: input, shape index: {}]   ;;  %s1095_s7 = inlined_call_operand.hbm [shape: bf16[128,128], index: 7, kind: input, shape index: {}]   ;;  %s1096_s8 = inlined_call_operand.<no memory space> [shape: f32[1,1], index: 8, kind: input, shape index: {}]   ;;  %s1097_s9 = inlined_call_operand.hbm [shape: bf16[8,128], index: 9, kind: output, shape index: {}]  }
   0x1   :  { %16 = vsyncpa [#allocation7], 0 }
   0x2   :  { %17 = vsyncpa [#allocation10], 0 }
   0x3   :  { %18 = vsyncpa [#allocation5], 0  ;;  %s892_s30 = smov [#allocation6]   ;;  %s752_s13 = scalar_lea.hbm %s1090_s2, 1024 }
   0x4   :  { %s36_s10 = sshll.u32 %s892_s30, 4  ;;  %p753_p0 = scmp.ne.s32.totalorder %s1090_s2, %s752_s13  ;;  %s37_s10 = int_to_ptr.vmem [resolvable:$true] %s36_s10 }
   0x5   :  { %p756_p1 = scmp.lt.u32.totalorder %s752_s13, %s1090_s2 }
   0x7   :  { %p758_p2 = pnand %p756_p1, %p753_p0 }
   0x9   :  { %761 = shalt.err (!%p758_p2)
}
   0xa   :  { %s762_s18 = scalar_lea.vmem %s37_s10, 1024  ;;  %p767_p4 = scmp.lt.s32.totalorder %s37_s10, %s37_s10 }
   0xb   :  { %p763_p3 = scmp.ne.s32.totalorder %s37_s10, %s762_s18  ;;  %p768_p5 = scmp.lt.s32.totalorder %s762_s18, %s762_s18 }
   0xd   :  { %p769_p6 = por %p768_p5, %p767_p4 }
   0xf   :  { %p770_p7 = pnand %p769_p6, %p763_p3 }
  0x11   :  { %773 = shalt.err (!%p770_p7)
}
  0x12   :  { %s893_s19 = smov 64   ;;  %s894_s20 = smov 4  }
  0x13   :  { %42 = dma.hbm_to_vmem [thread:$0]  %s1090_s2, 1024, %s37_s10, [#allocation7], %s893_s19, %s893_s19, %s894_s20  }
  0x14   :  { %s895_s23 = smov [#allocation9]   ;;  %s896_s25 = smov [#allocation3]  }
  0x15   :  { %s64_s24 = sshll.u32 %s895_s23, 4  ;;  %s25_s26 = sshll.u32 %s896_s25, 4  ;;  %s65_s24 = int_to_ptr.vmem [resolvable:$true] %s64_s24  ;;  %s26_s26 = int_to_ptr.vmem [resolvable:$true] %s25_s26 }
  0x16   :  { %s774_s29 = scalar_lea.hbm %s1094_s6, 1024 }
  0x17   :  { %p775_p8 = scmp.ne.s32.totalorder %s1094_s6, %s774_s29  ;;  %p778_p9 = scmp.lt.u32.totalorder %s774_s29, %s1094_s6 }
  0x19   :  { %p780_p10 = pnand %p778_p9, %p775_p8 }
  0x1b   :  { %783 = shalt.err (!%p780_p10)
}
  0x1c   :  { %s784_s2 = scalar_lea.vmem %s65_s24, 1024  ;;  %p789_p12 = scmp.lt.s32.totalorder %s65_s24, %s65_s24 }
  0x1d   :  { %p785_p11 = scmp.ne.s32.totalorder %s65_s24, %s784_s2  ;;  %p790_p13 = scmp.lt.s32.totalorder %s784_s2, %s784_s2 }
  0x1f   :  { %p791_p0 = por %p790_p13, %p789_p12 }
  0x21   :  { %p792_p1 = pnand %p791_p0, %p785_p11 }
  0x23   :  { %795 = shalt.err (!%p792_p1)
}
  0x24   :  { %70 = dma.hbm_to_vmem [thread:$0]  %s1094_s6, 1024, %s65_s24, [#allocation10], %s893_s19, %s893_s19, %s894_s20  }
  0x25   :  { %s796_s17 = scalar_lea.hbm %s1088_s0, 64 }
  0x26   :  { %p797_p2 = scmp.ne.s32.totalorder %s1088_s0, %s796_s17  ;;  %p800_p3 = scmp.lt.u32.totalorder %s796_s17, %s1088_s0 }
  0x28   :  { %p802_p4 = pnand %p800_p3, %p797_p2 }
  0x2a   :  { %805 = shalt.err (!%p802_p4)
}
  0x2b   :  { %s806_s25 = scalar_lea.vmem %s26_s26, 64  ;;  %p811_p6 = scmp.lt.s32.totalorder %s26_s26, %s26_s26 }
  0x2c   :  { %p807_p5 = scmp.ne.s32.totalorder %s26_s26, %s806_s25  ;;  %p812_p7 = scmp.lt.s32.totalorder %s806_s25, %s806_s25 }
  0x2e   :  { %p813_p8 = por %p812_p7, %p811_p6 }
  0x30   :  { %p814_p9 = pnand %p813_p8, %p807_p5 }
  0x32   :  { %817 = shalt.err (!%p814_p9)
}
  0x33   :  { %28 = dma.hbm_to_vmem [thread:$0]  %s1088_s0, 64, %s26_s26, [#allocation4]  }
  0x34   :  { %s897_s27 = smov [#allocation8]   ;;  %s898_s29 = smov [#allocation11]  }
  0x35   :  { %s50_s28 = sshll.u32 %s897_s27, 4  ;;  %s76_s30 = sshll.u32 %s898_s29, 4  ;;  %s51_s28 = int_to_ptr.vmem [resolvable:$true] %s50_s28  ;;  %s77_s30 = int_to_ptr.vmem [resolvable:$true] %s76_s30 }
  0x36   :  { %s818_s13 = scalar_lea.hbm %s1092_s4, 1024 }
  0x37   :  { %p819_p10 = scmp.ne.s32.totalorder %s1092_s4, %s818_s13  ;;  %p822_p11 = scmp.lt.u32.totalorder %s818_s13, %s1092_s4 }
  0x39   :  { %p824_p12 = pnand %p822_p11, %p819_p10 }
  0x3b   :  { %827 = shalt.err (!%p824_p12)
}
  0x3c   :  { %s828_s0 = scalar_lea.vmem %s51_s28, 1024  ;;  %p833_p0 = scmp.lt.s32.totalorder %s51_s28, %s51_s28 }
  0x3d   :  { %p829_p13 = scmp.ne.s32.totalorder %s51_s28, %s828_s0  ;;  %p834_p1 = scmp.lt.s32.totalorder %s828_s0, %s828_s0 }
  0x3f   :  { %p835_p2 = por %p834_p1, %p833_p0 }
  0x41   :  { %p836_p3 = pnand %p835_p2, %p829_p13 }
  0x43   :  { %839 = shalt.err (!%p836_p3)
}
  0x44   :  { %56 = dma.hbm_to_vmem [thread:$0]  %s1092_s4, 1024, %s51_s28, [#allocation7], %s893_s19, %s893_s19, %s894_s20  }
  0x45   :  { %s840_s21 = scalar_lea.hbm %s1095_s7, 1024 }
  0x46   :  { %p841_p4 = scmp.ne.s32.totalorder %s1095_s7, %s840_s21  ;;  %p844_p5 = scmp.lt.u32.totalorder %s840_s21, %s1095_s7 }
  0x48   :  { %p846_p6 = pnand %p844_p5, %p841_p4 }
  0x4a   :  { %849 = shalt.err (!%p846_p6)
}
  0x4b   :  { %s850_s24 = scalar_lea.vmem %s77_s30, 1024  ;;  %p855_p8 = scmp.lt.s32.totalorder %s77_s30, %s77_s30 }
  0x4c   :  { %p851_p7 = scmp.ne.s32.totalorder %s77_s30, %s850_s24  ;;  %p856_p9 = scmp.lt.s32.totalorder %s850_s24, %s850_s24 }
  0x4e   :  { %p857_p10 = por %p856_p9, %p855_p8 }
  0x50   :  { %p858_p11 = pnand %p857_p10, %p851_p7 }
  0x52   :  { %861 = shalt.err (!%p858_p11)
}
  0x53   :  { %82 = dma.hbm_to_vmem [thread:$0]  %s1095_s7, 1024, %s77_s30, [#allocation10], %s893_s19, %s893_s19, %s894_s20  }
  0x54   :  { %884 = dma.done.wait [#allocation4], 64  }
  0x55   :  { %885 = vsyncadd [#allocation4], 4294967232 }
  0x56   :  { %886 = dma.done.wait [#allocation7], 2048  }
  0x57   :  { %887 = vsyncadd [#allocation7], 4294965248 }
  0x58   :  { %888 = dma.done.wait [#allocation10], 2048  }
  0x59   :  { %889 = vsyncadd [#allocation10], 4294965248  ;;  %v899_v0 = vmov 0.0   ;;  %vm900_vm0 = vmmov 0   ;;  %v720_v1 = vld [vmem:[#allocation6] sm:$0xff]   ;;  %v722_v3 = vld [vmem:[#allocation6 + $0x8] sm:$0xff]   ;;  %v538_v53 = vstv %s1096_s8 }
  0x5a   :  { %630 = vmatprep.subr.bf16.mxu0 %v899_v0  ;;  %650 = vmatprep.subr.bf16.mxu1 %v899_v0  ;;  %v721_v2 = vld [vmem:[#allocation8] sm:$0xff]   ;;  %v723_v4 = vld [vmem:[#allocation8 + $0x8] sm:$0xff]   ;;  %v724_v5 = vld [vmem:[#allocation6 + $0x10] sm:$0xff]   ;;  %s901_s30 = smov [#allocation12]  }
  0x5b   :  { %646 = vmatprep.mubr.msk.bf16.mxu0 %vm900_vm0, %v899_v0  ;;  %666 = vmatprep.mubr.msk.bf16.mxu1 %vm900_vm0, %v899_v0  ;;  %v725_v6 = vld [vmem:[#allocation8 + $0x10] sm:$0xff]   ;;  %v726_v7 = vld [vmem:[#allocation6 + $0x18] sm:$0xff]   ;;  %v728_v9 = vld [vmem:[#allocation6 + $0x20] sm:$0xff]   ;;  %s549_s11 = sshll.u32 %s901_s30, 4  ;;  %s550_s11 = int_to_ptr.vmem [resolvable:$true] %s549_s11 }
  0x5c   :  { %631 = vmatpush3.bf16.msra.mxu0 %v720_v1  ;;  %651 = vmatpush3.bf16.msra.mxu1 %v721_v2  ;;  %v727_v8 = vld [vmem:[#allocation8 + $0x18] sm:$0xff]   ;;  %v729_v10 = vld [vmem:[#allocation8 + $0x20] sm:$0xff]   ;;  %v730_v11 = vld [vmem:[#allocation6 + $0x28] sm:$0xff]   ;;  %s862_s12 = scalar_lea.vmem %s550_s11, 64  ;;  %p867_p13 = scmp.lt.s32.totalorder %s550_s11, %s550_s11 }
  0x5d   :  { %632 = vmatprep.subr.bf16.mxu0 %v899_v0  ;;  %652 = vmatprep.subr.bf16.mxu1 %v899_v0  ;;  %v731_v12 = vld [vmem:[#allocation8 + $0x28] sm:$0xff]   ;;  %v732_v13 = vld [vmem:[#allocation6 + $0x30] sm:$0xff]   ;;  %v734_v15 = vld [vmem:[#allocation6 + $0x38] sm:$0xff]   ;;  %p863_p12 = scmp.ne.s32.totalorder %s550_s11, %s862_s12  ;;  %p868_p0 = scmp.lt.s32.totalorder %s862_s12, %s862_s12 }
  0x5e   :  { %v733_v14 = vld [vmem:[#allocation8 + $0x30] sm:$0xff]   ;;  %v735_v16 = vld [vmem:[#allocation8 + $0x38] sm:$0xff]   ;;  %v736_v18 = vld [vmem:[#allocation11] sm:$0xff]  }
  0x5f   :  { %v101_v17 = vld [vmem:[#allocation3] sm:$0xf]  ;;  %v737_v20 = vld [vmem:[#allocation9] sm:$0xff]   ;;  %v738_v21 = vld [vmem:[#allocation11 + $0x8] sm:$0xff]   ;;  %p869_p1 = por %p868_p0, %p867_p13 }
  0x60   :  { %633 = vmatpush3.bf16.msra.mxu0 %v722_v3  ;;  %653 = vmatpush3.bf16.msra.mxu1 %v723_v4  ;;  %v214_v19 = vld [vmem:[%s1089_s1] sm:$0xf]  ;;  %v739_v22 = vld [vmem:[#allocation9 + $0x8] sm:$0xff]   ;;  %v740_v23 = vld [vmem:[#allocation11 + $0x10] sm:$0xff]  }
  0x61   :  { %634 = vmatprep.subr.bf16.mxu0 %v899_v0  ;;  %654 = vmatprep.subr.bf16.mxu1 %v899_v0  ;;  %v741_v24 = vld [vmem:[#allocation9 + $0x10] sm:$0xff]   ;;  %v742_v25 = vld [vmem:[#allocation11 + $0x18] sm:$0xff]   ;;  %v744_v27 = vld [vmem:[#allocation11 + $0x20] sm:$0xff]   ;;  %p870_p2 = pnand %p869_p1, %p863_p12 }
  0x62   :  { %v743_v26 = vld [vmem:[#allocation9 + $0x18] sm:$0xff]   ;;  %v745_v28 = vld [vmem:[#allocation9 + $0x20] sm:$0xff]   ;;  %v746_v29 = vld [vmem:[#allocation11 + $0x28] sm:$0xff]  }
  0x63   :  { %v747_v30 = vld [vmem:[#allocation9 + $0x28] sm:$0xff]   ;;  %v748_v31 = vld [vmem:[#allocation11 + $0x30] sm:$0xff]   ;;  %v750_v33 = vld [vmem:[#allocation11 + $0x38] sm:$0xff]  }
  0x64   :  { %635 = vmatpush3.bf16.msra.mxu0 %v724_v5  ;;  %655 = vmatpush3.bf16.msra.mxu1 %v725_v6  ;;  %v749_v32 = vld [vmem:[#allocation9 + $0x30] sm:$0xff]   ;;  %v751_v34 = vld [vmem:[#allocation9 + $0x38] sm:$0xff]  }
  0x65   :  { %636 = vmatprep.subr.bf16.mxu0 %v899_v0  ;;  %656 = vmatprep.subr.bf16.mxu1 %v899_v0  ;;  %v560_v35 = vld [vmem:[%s1091_s3] ss:$0 sm:$0xff] }
  0x66   :  { %v569_v36 = vld [vmem:[%s1093_s5] ss:$0 sm:$0xff] }
  0x68   :  { %637 = vmatpush3.bf16.msra.mxu0 %v726_v7  ;;  %657 = vmatpush3.bf16.msra.mxu1 %v727_v8 }
  0x69   :  { %638 = vmatprep.subr.bf16.mxu0 %v899_v0  ;;  %658 = vmatprep.subr.bf16.mxu1 %v899_v0 }
  0x6c   :  { %639 = vmatpush3.bf16.msra.mxu0 %v728_v9  ;;  %659 = vmatpush3.bf16.msra.mxu1 %v729_v10 }
  0x6d   :  { %640 = vmatprep.subr.bf16.mxu0 %v899_v0  ;;  %660 = vmatprep.subr.bf16.mxu1 %v899_v0 }
  0x70   :  { %641 = vmatpush3.bf16.msra.mxu0 %v730_v11  ;;  %661 = vmatpush3.bf16.msra.mxu1 %v731_v12 }
  0x71   :  { %642 = vmatprep.subr.bf16.mxu0 %v899_v0  ;;  %662 = vmatprep.subr.bf16.mxu1 %v899_v0 }
  0x74   :  { %643 = vmatpush3.bf16.msra.mxu0 %v732_v13  ;;  %663 = vmatpush3.bf16.msra.mxu1 %v733_v14 }
  0x75   :  { %644 = vmatprep.subr.bf16.mxu0 %v899_v0  ;;  %664 = vmatprep.subr.bf16.mxu1 %v899_v0 }
  0x78   :  { %645 = vmatpush3.bf16.msra.mxu0 %v734_v15  ;;  %665 = vmatpush3.bf16.msra.mxu1 %v735_v16 }
  0x79   :  { %670 = vmatprep.subr.bf16.mxu0 %v899_v0  ;;  %690 = vmatprep.subr.bf16.mxu1 %v899_v0 }
  0x7b   :  { %647 = vmatmul.mubr.bf16.vlgmr.msra.gmra.mrb[0].mxu0 %v101_v17  ;;  %667 = vmatmul.mubr.bf16.vlgmr.msra.gmra.mrb[0].mxu1 %v214_v19 }
  0x7c   :  { %671 = vmatpush3.bf16.msra.mxu0 %v736_v18  ;;  %691 = vmatpush3.bf16.msra.mxu1 %v737_v20 }
  0x7d   :  { %672 = vmatprep.subr.bf16.mxu0 %v899_v0  ;;  %692 = vmatprep.subr.bf16.mxu1 %v899_v0 }
  0x7e   :  { %686 = vmatprep.mubr.msk.bf16.mxu0 %vm900_vm0, %v899_v0  ;;  %706 = vmatprep.mubr.msk.bf16.mxu1 %vm900_vm0, %v899_v0 }
  0x80   :  { %673 = vmatpush3.bf16.msra.mxu0 %v738_v21  ;;  %693 = vmatpush3.bf16.msra.mxu1 %v739_v22 }
  0x81   :  { %674 = vmatprep.subr.bf16.mxu0 %v899_v0  ;;  %694 = vmatprep.subr.bf16.mxu1 %v899_v0 }
  0x84   :  { %675 = vmatpush3.bf16.msra.mxu0 %v740_v23  ;;  %695 = vmatpush3.bf16.msra.mxu1 %v741_v24 }
  0x85   :  { %676 = vmatprep.subr.bf16.mxu0 %v899_v0  ;;  %696 = vmatprep.subr.bf16.mxu1 %v899_v0 }
  0x88   :  { %677 = vmatpush3.bf16.msra.mxu0 %v742_v25  ;;  %697 = vmatpush3.bf16.msra.mxu1 %v743_v26 }
  0x89   :  { %678 = vmatprep.subr.bf16.mxu0 %v899_v0  ;;  %698 = vmatprep.subr.bf16.mxu1 %v899_v0 }
  0x8c   :  { %679 = vmatpush3.bf16.msra.mxu0 %v744_v27  ;;  %699 = vmatpush3.bf16.msra.mxu1 %v745_v28 }
  0x8d   :  { %680 = vmatprep.subr.bf16.mxu0 %v899_v0  ;;  %700 = vmatprep.subr.bf16.mxu1 %v899_v0 }
  0x90   :  { %681 = vmatpush3.bf16.msra.mxu0 %v746_v29  ;;  %701 = vmatpush3.bf16.msra.mxu1 %v747_v30 }
  0x91   :  { %682 = vmatprep.subr.bf16.mxu0 %v899_v0  ;;  %702 = vmatprep.subr.bf16.mxu1 %v899_v0 }
  0x94   :  { %683 = vmatpush3.bf16.msra.mxu0 %v748_v31  ;;  %703 = vmatpush3.bf16.msra.mxu1 %v749_v32 }
  0x95   :  { %684 = vmatprep.subr.bf16.mxu0 %v899_v0  ;;  %704 = vmatprep.subr.bf16.mxu1 %v899_v0 }
  0x98   :  { %685 = vmatpush3.bf16.msra.mxu0 %v750_v33  ;;  %705 = vmatpush3.bf16.msra.mxu1 %v751_v34 }
 0x14e   :  { %v207_v37 = vpop.f32.mrb[0].mxu0  ;;  %v320_v39 = vpop.f32.mrb[0].mxu1 }
 0x14f   :  { %v208_v38 = vadd.f32 %v560_v35, %v207_v37  ;;  %v648_v40 = vpop.f32.mrb[1].mxu0  ;;  %v321_v41 = vadd.f32 %v569_v36, %v320_v39  ;;  %v668_v42 = vpop.f32.mrb[1].mxu1 }
 0x150   :  { %v210_v43 = vpop.f32.mrb[2].mxu0  ;;  %v323_v45 = vpop.f32.mrb[2].mxu1 }
 0x151   :  { %v213_v44 = vmax.f32 %v208_v38, 0.0  ;;  %v649_v46 = vpop.f32.mrb[3].mxu0  ;;  %v326_v47 = vmax.f32 %v321_v41, 0.0  ;;  %v669_v48 = vpop.f32.mrb[3].mxu1 }
 0x153   :  { %v327_v49 = vpack.c.bf16 %v213_v44, %v213_v44  ;;  %v344_v50 = vpack.c.bf16 %v326_v47, %v326_v47 }
 0x155   :  { %707 = vmatmul.mubr.bf16.vlgmr.msra.gmra.mrb[4].mxu1 %v327_v49  ;;  %687 = vmatmul.mubr.bf16.vlgmr.msra.gmra.mrb[4].mxu0 %v344_v50 }
 0x228   :  { %v531_v51 = vpop.f32.mrb[4].mxu1  ;;  %v443_v52 = vpop.f32.mrb[4].mxu0 }
 0x229   :  { %v708_v54 = vpop.f32.mrb[5].mxu1  ;;  %v532_v55 = vadd.f32 %v531_v51, %v443_v52  ;;  %v688_v56 = vpop.f32.mrb[5].mxu0 }
 0x22a   :  { %v534_v57 = vpop.f32.mrb[6].mxu1  ;;  %v446_v58 = vpop.f32.mrb[6].mxu0 }
 0x22b   :  { %v709_v59 = vpop.f32.mrb[7].mxu1  ;;  %v539_v60 = vadd.f32 %v538_v53, %v532_v55  ;;  %v689_v61 = vpop.f32.mrb[7].mxu0 }
 0x22d   :  { %v540_v62 = vmax.f32 %v539_v60, 0.0 }
 0x22f   :  { %v541_v63 = vpack.c.bf16 %v540_v62, %v540_v62 }
 0x231   :  { %542 = vst [vmem:[#allocation12] sm:$0xf] %v541_v63 }
 0x232   :  { %873 = shalt.err (!%p870_p2)
}
 0x233   :  { %s874_s2 = scalar_lea.hbm %s1097_s9, 64 }
 0x234   :  { %p875_p3 = scmp.ne.s32.totalorder %s1097_s9, %s874_s2  ;;  %p878_p4 = scmp.lt.u32.totalorder %s874_s2, %s1097_s9 }
 0x236   :  { %p880_p5 = pnand %p878_p4, %p875_p3 }
 0x238   :  { %883 = shalt.err (!%p880_p5)
}
 0x239   :  { %552 = dma.vmem_to_hbm [thread:$0]  %s550_s11, 64, %s1097_s9, [#allocation5]  }
 0x23a   :  { %890 = dma.done.wait [#allocation5], 64  }
 0x23b   :  { %891 = vsyncadd [#allocation5], 4294967232 }
 0x23c   :  { %556 = vsyncpa [#allocation4], 1 }
 0x23d   :  { %557 = vsyncpa [#allocation7], 1 }
 0x23e   :  { %558 = vsyncpa [#allocation10], 1 }
 0x23f   :  { %559 = vsyncpa [#allocation5], 1 }

</bundles_post_ra>
